<compile_context>
chip_gen: v7x
topology: tpu7x:2x2x1
jax: 0.10.0
libtpu: 0.0.40
codegen_flags: <defaults>
</compile_context>

<pallas_src>
import functools

import jax
import jax.numpy as jnp
from jax.experimental import pallas as pl
from jax.experimental.pallas import tpu as pltpu


def _channel_attention_kernel(x_ref, w1t_ref, w2t_ref, o_ref,
                              sum_acc, max_acc, *, hw_total, lw):
    """One grid step: accumulate pooled stats; finalize with the MLP.

    x_ref   : (Bt, C, THW) native dtype — one spatial tile
    w1t_ref : (C, Cr) f32   (fc1 weight, pre-transposed; 1x1 conv == matmul)
    w2t_ref : (Cr, C) f32   (fc2 weight, pre-transposed)
    o_ref   : (Bt, C) f32   sigmoid attention (written on last HW step only)
    sum_acc : (Bt, C, lw) f32 VMEM scratch — running partial sums
    max_acc : (Bt, C, lw) f32 VMEM scratch — running partial maxes
    """
    hw_idx = pl.program_id(1)
    n_hw = pl.num_programs(1)

    @pl.when(hw_idx == 0)
    def _init():
        sum_acc[...] = jnp.zeros_like(sum_acc)
        max_acc[...] = jnp.full_like(max_acc, -jnp.inf)

    x = x_ref[...].astype(jnp.float32)              # widen in-register (v5e: no bf16 VPU)
    thw = x.shape[-1]

    if hw_total % thw != 0:
        # Last tile overruns H*W: mask padded lanes (0 for sum, -inf for max).
        lane = jax.lax.broadcasted_iota(jnp.int32, x.shape, 2)
        valid = (hw_idx * thw + lane) < hw_total
        x_s = jnp.where(valid, x, 0.0)
        x_m = jnp.where(valid, x, -jnp.inf)
    else:
        x_s = x
        x_m = x

    # Fold the tile into lw-wide partial accumulators with VPU elementwise ops;
    # the cross-lane reduce happens once, in the finalize branch.
    k = thw // lw
    s = x_s[:, :, 0:lw]
    m = x_m[:, :, 0:lw]
    for j in range(1, k):
        lo = j * lw
        s = s + x_s[:, :, lo:lo + lw]
        m = jnp.maximum(m, x_m[:, :, lo:lo + lw])
    sum_acc[...] = sum_acc[...] + s
    max_acc[...] = jnp.maximum(max_acc[...], m)

    @pl.when(hw_idx == n_hw - 1)
    def _finalize():
        avg = jnp.sum(sum_acc[...], axis=-1) * (1.0 / hw_total)   # (Bt, C)
        mx = jnp.max(max_acc[...], axis=-1)                       # (Bt, C)

        w1t = w1t_ref[...]                                        # (C, Cr)
        w2t = w2t_ref[...]                                        # (Cr, C)

        h_a = jnp.maximum(
            jnp.dot(avg, w1t, preferred_element_type=jnp.float32), 0.0)
        h_m = jnp.maximum(
            jnp.dot(mx, w1t, preferred_element_type=jnp.float32), 0.0)
        out = (jnp.dot(h_a, w2t, preferred_element_type=jnp.float32)
               + jnp.dot(h_m, w2t, preferred_element_type=jnp.float32))
        o_ref[...] = jax.nn.sigmoid(out).astype(o_ref.dtype)


def channel_attention(x, w1, w2, *, max_tile_hw=None):
    """x: (B, C, H, W) NCHW (any float dtype).  w1: (Cr, C).  w2: (C, Cr).

    Returns sigmoid channel attention of shape (B, C, 1, 1), dtype of x.
    """
    B, C, H, W = x.shape
    Cr = w1.shape[0]
    HW = H * W

    x_flat = x.reshape(B, C, HW)                     # keep native dtype on the wire
    w1t = jnp.transpose(w1).astype(jnp.float32)      # (C, Cr)
    w2t = jnp.transpose(w2).astype(jnp.float32)      # (Cr, C)

    # --- batch tile: full extent for small B, multiple of 8 otherwise -------
    Bt = min(B, 8) if (B % 8 == 0) else B

    # --- HW tile: lane-aligned (multiple of 128) or full extent, sized so the
    #     double-buffered x tile stays well inside every generation's VMEM ----
    itemsize = jnp.dtype(x.dtype).itemsize
    target_tile_bytes = 6 * 1024 * 1024              # ~6 MiB/buffer, ~12 MiB x2-buffered
    if HW <= 128:
        THW = HW                                     # full extent (no alignment needed)
    else:
        budget = max(128, target_tile_bytes // (Bt * C * itemsize))
        budget = (budget // 128) * 128
        hw_ceil = ((HW + 127) // 128) * 128
        THW = min(budget, hw_ceil)
    if max_tile_hw is not None:
        THW = max(128, min(THW, (max_tile_hw // 128) * 128)) if HW > 128 else THW
    LW = 128 if THW % 128 == 0 else THW              # accumulator lane width

    grid = (B // Bt, pl.cdiv(HW, THW))

    kernel = functools.partial(_channel_attention_kernel, hw_total=HW, lw=LW)

    cost = pl.CostEstimate(
        flops=8 * B * C * Cr,                        # two tiny MLP branches
        transcendentals=B * C,                       # sigmoid
        bytes_accessed=(x_flat.size * itemsize
                        + (w1t.size + w2t.size) * 4 + B * C * 4),
    )

    out = pl.pallas_call(
        kernel,
        out_shape=jax.ShapeDtypeStruct((B, C), jnp.float32),
        grid=grid,
        in_specs=[
            pl.BlockSpec((Bt, C, THW), lambda b, h: (b, 0, h)),
            pl.BlockSpec((C, Cr), lambda b, h: (0, 0)),
            pl.BlockSpec((Cr, C), lambda b, h: (0, 0)),
        ],
        out_specs=pl.BlockSpec((Bt, C), lambda b, h: (b, 0)),
        scratch_shapes=[
            pltpu.VMEM((Bt, C, LW), jnp.float32),    # running sum
            pltpu.VMEM((Bt, C, LW), jnp.float32),    # running max
        ],
        compiler_params=pltpu.CompilerParams(
            dimension_semantics=("parallel", "arbitrary")),
        cost_estimate=cost,
    )(x_flat, w1t, w2t)

    return out.reshape(B, C, 1, 1).astype(x.dtype)


def channel_attention_ref(x, w1, w2):
    """Pure-JAX reference mirroring the PyTorch forward."""
    B, C, H, W = x.shape
    xf = x.astype(jnp.float32)
    avg = jnp.mean(xf, axis=(2, 3))                  # (B, C)
    mx = jnp.max(xf, axis=(2, 3))                    # (B, C)
    h_a = jnp.maximum(avg @ w1.astype(jnp.float32).T, 0.0)
    h_m = jnp.maximum(mx @ w1.astype(jnp.float32).T, 0.0)
    out = h_a @ w2.astype(jnp.float32).T + h_m @ w2.astype(jnp.float32).T
    return jax.nn.sigmoid(out).reshape(B, C, 1, 1).astype(x.dtype)


if __name__ == "__main__":
    B, C, ratio = 2, 32, 8
    Cr = C // ratio

    key = jax.random.PRNGKey(0)
    kx, k1, k2, kx2 = jax.random.split(key, 4)
    # Conv2d(in, out, 1, bias=False) weights are (out, in, 1, 1) -> (out, in)
    w1 = jax.random.normal(k1, (Cr, C), dtype=jnp.float32) * 0.1   # fc1
    w2 = jax.random.normal(k2, (C, Cr), dtype=jnp.float32) * 0.1   # fc2

    # --- case 1: f32, HW = 256, single spatial tile -------------------------
    x1 = jax.random.normal(kx, (B, C, 16, 16), dtype=jnp.float32)
    y1 = channel_attention(x1, w1, w2)
    jax.block_until_ready(y1)
    y1_ref = channel_attention_ref(x1, w1, w2)
    assert y1.shape == (B, C, 1, 1)
    assert jnp.allclose(y1, y1_ref, atol=1e-5, rtol=1e-5), "f32 single-tile mismatch"

    # --- case 2: f32, HW = 289 with forced 128-lane tiles (multi-step
    #     accumulation + partial-tile masking path) --------------------------
    x2 = jax.random.normal(kx2, (B, C, 17, 17), dtype=jnp.float32)
    y2 = channel_attention(x2, w1, w2, max_tile_hw=128)
    jax.block_until_ready(y2)
    y2_ref = channel_attention_ref(x2, w1, w2)
    assert jnp.allclose(y2, y2_ref, atol=1e-5, rtol=1e-5), "f32 tiled/masked mismatch"

    # --- case 3: bf16 on the wire (kernel widens to f32 internally) ---------
    x3 = x2.astype(jnp.bfloat16)
    y3 = channel_attention(x3, w1, w2, max_tile_hw=128)
    jax.block_until_ready(y3)
    y3_ref = channel_attention_ref(x3, w1, w2)
    assert jnp.allclose(y3.astype(jnp.float32), y3_ref.astype(jnp.float32),
                        atol=2e-2, rtol=2e-2), "bf16 mismatch"

    print("KERNEL_OK")
</pallas_src>

<mosaic_0001>
module attributes {stable_mosaic.version = 11 : i64} {
  func.func @_channel_attention_kernel(%arg0: i32, %arg1: i32, %arg2: memref<2x32x256xf32, #tpu.memory_space<vmem>>, %arg3: memref<32x4xf32, #tpu.memory_space<vmem>>, %arg4: memref<4x32xf32, #tpu.memory_space<vmem>>, %arg5: memref<2x32xf32, #tpu.memory_space<vmem>>, %arg6: memref<2x32x128xf32, #tpu.memory_space<vmem>>, %arg7: memref<2x32x128xf32, #tpu.memory_space<vmem>>) attributes {dimension_semantics = [#tpu.dimension_semantics<parallel>, #tpu.dimension_semantics<arbitrary>], iteration_bounds = array<i64: 1, 1>, scalar_prefetch = 0 : i64, scratch_operands = 2 : i64, tpu.core_type = #tpu.core_type<tc>, window_params = [{transform_indices = @transform_0, window_bounds = array<i64: 2, 32, 256>}, {pipeline_mode = #tpu.pipeline_mode<synchronous>, transform_indices = @transform_1, window_bounds = array<i64: 32, 4>}, {pipeline_mode = #tpu.pipeline_mode<synchronous>, transform_indices = @transform_2, window_bounds = array<i64: 4, 32>}, {transform_indices = @transform_3, window_bounds = array<i64: 2, 32>}]} {
    %c0_i32 = arith.constant 0 : i32
    %0 = arith.cmpi eq, %arg1, %c0_i32 : i32
    %1 = arith.extui %0 : i1 to i32
    %c0_i32_0 = arith.constant 0 : i32
    %2 = arith.cmpi ne, %1, %c0_i32_0 : i32
    scf.if %2 {
      %cst = arith.constant 0.000000e+00 : f32
      %19 = vector.broadcast %cst : f32 to vector<2x32x128xf32>
      %c0_17 = arith.constant 0 : index
      %c0_18 = arith.constant 0 : index
      %c0_19 = arith.constant 0 : index
      %20 = vector.load %arg6[%c0_17, %c0_18, %c0_19] : memref<2x32x128xf32, #tpu.memory_space<vmem>>, vector<2x32x128xf32>
      tpu.vector_store %arg6[%c0_17, %c0_18, %c0_19], %19 {strides = array<i32>} : memref<2x32x128xf32, #tpu.memory_space<vmem>>, vector<2x32x128xf32>,
      %cst_20 = arith.constant 0xFF800000 : f32
      %21 = vector.broadcast %cst_20 : f32 to vector<2x32x128xf32>
      %c0_21 = arith.constant 0 : index
      %c0_22 = arith.constant 0 : index
      %c0_23 = arith.constant 0 : index
      %22 = vector.load %arg7[%c0_21, %c0_22, %c0_23] : memref<2x32x128xf32, #tpu.memory_space<vmem>>, vector<2x32x128xf32>
      tpu.vector_store %arg7[%c0_21, %c0_22, %c0_23], %21 {strides = array<i32>} : memref<2x32x128xf32, #tpu.memory_space<vmem>>, vector<2x32x128xf32>,
    } else {
    }
    %c0 = arith.constant 0 : index
    %c0_1 = arith.constant 0 : index
    %c0_2 = arith.constant 0 : index
    %3 = vector.load %arg2[%c0, %c0_1, %c0_2] : memref<2x32x256xf32, #tpu.memory_space<vmem>>, vector<2x32x256xf32>
    %4 = vector.extract_strided_slice %3 {offsets = [0, 0, 0], sizes = [2, 32, 128], strides = [1, 1, 1]} : vector<2x32x256xf32> to vector<2x32x128xf32>
    %5 = vector.extract_strided_slice %3 {offsets = [0, 0, 0], sizes = [2, 32, 128], strides = [1, 1, 1]} : vector<2x32x256xf32> to vector<2x32x128xf32>
    %6 = vector.extract_strided_slice %3 {offsets = [0, 0, 128], sizes = [2, 32, 128], strides = [1, 1, 1]} : vector<2x32x256xf32> to vector<2x32x128xf32>
    %7 = arith.addf %4, %6 : vector<2x32x128xf32>
    %8 = vector.extract_strided_slice %3 {offsets = [0, 0, 128], sizes = [2, 32, 128], strides = [1, 1, 1]} : vector<2x32x256xf32> to vector<2x32x128xf32>
    %9 = arith.maximumf %5, %8 : vector<2x32x128xf32>
    %c0_3 = arith.constant 0 : index
    %c0_4 = arith.constant 0 : index
    %c0_5 = arith.constant 0 : index
    %10 = vector.load %arg6[%c0_3, %c0_4, %c0_5] : memref<2x32x128xf32, #tpu.memory_space<vmem>>, vector<2x32x128xf32>
    %11 = arith.addf %10, %7 : vector<2x32x128xf32>
    %c0_6 = arith.constant 0 : index
    %c0_7 = arith.constant 0 : index
    %c0_8 = arith.constant 0 : index
    %12 = vector.load %arg6[%c0_6, %c0_7, %c0_8] : memref<2x32x128xf32, #tpu.memory_space<vmem>>, vector<2x32x128xf32>
    tpu.vector_store %arg6[%c0_6, %c0_7, %c0_8], %11 {strides = array<i32>} : memref<2x32x128xf32, #tpu.memory_space<vmem>>, vector<2x32x128xf32>,
    %c0_9 = arith.constant 0 : index
    %c0_10 = arith.constant 0 : index
    %c0_11 = arith.constant 0 : index
    %13 = vector.load %arg7[%c0_9, %c0_10, %c0_11] : memref<2x32x128xf32, #tpu.memory_space<vmem>>, vector<2x32x128xf32>
    %14 = arith.maximumf %13, %9 : vector<2x32x128xf32>
    %c0_12 = arith.constant 0 : index
    %c0_13 = arith.constant 0 : index
    %c0_14 = arith.constant 0 : index
    %15 = vector.load %arg7[%c0_12, %c0_13, %c0_14] : memref<2x32x128xf32, #tpu.memory_space<vmem>>, vector<2x32x128xf32>
    tpu.vector_store %arg7[%c0_12, %c0_13, %c0_14], %14 {strides = array<i32>} : memref<2x32x128xf32, #tpu.memory_space<vmem>>, vector<2x32x128xf32>,
    %c0_i32_15 = arith.constant 0 : i32
    %16 = arith.cmpi eq, %arg1, %c0_i32_15 : i32
    %17 = arith.extui %16 : i1 to i32
    %c0_i32_16 = arith.constant 0 : i32
    %18 = arith.cmpi ne, %17, %c0_i32_16 : i32
    scf.if %18 {
      %c0_17 = arith.constant 0 : index
      %c0_18 = arith.constant 0 : index
      %c0_19 = arith.constant 0 : index
      %19 = vector.load %arg6[%c0_17, %c0_18, %c0_19] : memref<2x32x128xf32, #tpu.memory_space<vmem>>, vector<2x32x128xf32>
      %cst = arith.constant dense<0.000000e+00> : vector<2x32xf32>
      %20 = vector.multi_reduction <add>, %19, %cst [2] : vector<2x32x128xf32> to vector<2x32xf32>
      %cst_20 = arith.constant 3.906250e-03 : f32
      %21 = vector.broadcast %cst_20 : f32 to vector<2x32xf32>
      %22 = arith.mulf %20, %21 : vector<2x32xf32>
      %c0_21 = arith.constant 0 : index
      %c0_22 = arith.constant 0 : index
      %c0_23 = arith.constant 0 : index
      %23 = vector.load %arg7[%c0_21, %c0_22, %c0_23] : memref<2x32x128xf32, #tpu.memory_space<vmem>>, vector<2x32x128xf32>
      %cst_24 = arith.constant dense<0xFF800000> : vector<2x32xf32>
      %24 = vector.multi_reduction <maximumf>, %23, %cst_24 [2] : vector<2x32x128xf32> to vector<2x32xf32>
      %c0_25 = arith.constant 0 : index
      %c0_26 = arith.constant 0 : index
      %25 = vector.load %arg3[%c0_25, %c0_26] : memref<32x4xf32, #tpu.memory_space<vmem>>, vector<32x4xf32>
      %c0_27 = arith.constant 0 : index
      %c0_28 = arith.constant 0 : index
      %26 = vector.load %arg4[%c0_27, %c0_28] : memref<4x32xf32, #tpu.memory_space<vmem>>, vector<4x32xf32>
      %cst_29 = arith.constant dense<0.000000e+00> : vector<2x4xf32>
      %27 = tpu.matmul %22, %25, %cst_29 {dimension_numbers = #tpu.dot_dimension_numbers<[1], [0], [0], [1], [0, 0, 1, 1], [], []>} : vector<2x32xf32>, vector<32x4xf32>, vector<2x4xf32> -> vector<2x4xf32>
      %cst_30 = arith.constant 0.000000e+00 : f32
      %28 = vector.broadcast %cst_30 : f32 to vector<2x4xf32>
      %29 = arith.maximumf %27, %28 : vector<2x4xf32>
      %cst_31 = arith.constant dense<0.000000e+00> : vector<2x4xf32>
      %30 = tpu.matmul %24, %25, %cst_31 {dimension_numbers = #tpu.dot_dimension_numbers<[1], [0], [0], [1], [0, 0, 1, 1], [], []>} : vector<2x32xf32>, vector<32x4xf32>, vector<2x4xf32> -> vector<2x4xf32>
      %cst_32 = arith.constant 0.000000e+00 : f32
      %31 = vector.broadcast %cst_32 : f32 to vector<2x4xf32>
      %32 = arith.maximumf %30, %31 : vector<2x4xf32>
      %cst_33 = arith.constant dense<0.000000e+00> : vector<2x32xf32>
      %33 = tpu.matmul %29, %26, %cst_33 {dimension_numbers = #tpu.dot_dimension_numbers<[1], [0], [0], [1], [0, 0, 1, 1], [], []>} : vector<2x4xf32>, vector<4x32xf32>, vector<2x32xf32> -> vector<2x32xf32>
      %cst_34 = arith.constant dense<0.000000e+00> : vector<2x32xf32>
      %34 = tpu.matmul %32, %26, %cst_34 {dimension_numbers = #tpu.dot_dimension_numbers<[1], [0], [0], [1], [0, 0, 1, 1], [], []>} : vector<2x4xf32>, vector<4x32xf32>, vector<2x32xf32> -> vector<2x32xf32>
      %35 = arith.addf %33, %34 : vector<2x32xf32>
      %36 = arith.negf %35 : vector<2x32xf32>
      %37 = math.exp %36 : vector<2x32xf32>
      %cst_35 = arith.constant 1.000000e+00 : f32
      %38 = vector.broadcast %cst_35 : f32 to vector<2x32xf32>
      %39 = arith.addf %38, %37 : vector<2x32xf32>
      %40 = arith.divf %38, %39 : vector<2x32xf32>
      %c0_36 = arith.constant 0 : index
      %c0_37 = arith.constant 0 : index
      %41 = vector.load %arg5[%c0_36, %c0_37] : memref<2x32xf32, #tpu.memory_space<vmem>>, vector<2x32xf32>
      tpu.vector_store %arg5[%c0_36, %c0_37], %40 {strides = array<i32>} : memref<2x32xf32, #tpu.memory_space<vmem>>, vector<2x32xf32>,
    } else {
    }
    return
  }
  func.func @transform_0(%arg0: i32, %arg1: i32) -> (i32, i32, i32) {
    %c0_i32 = arith.constant 0 : i32
    %c0_i32_0 = arith.constant 0 : i32
    return %arg0, %c0_i32, %arg1 : i32, i32, i32
  }
  func.func @transform_1(%arg0: i32, %arg1: i32) -> (i32, i32) {
    %c0_i32 = arith.constant 0 : i32
    %c0_i32_0 = arith.constant 0 : i32
    %c0_i32_1 = arith.constant 0 : i32
    return %c0_i32, %c0_i32_0 : i32, i32
  }
  func.func @transform_2(%arg0: i32, %arg1: i32) -> (i32, i32) {
    %c0_i32 = arith.constant 0 : i32
    %c0_i32_0 = arith.constant 0 : i32
    %c0_i32_1 = arith.constant 0 : i32
    return %c0_i32, %c0_i32_0 : i32, i32
  }
  func.func @transform_3(%arg0: i32, %arg1: i32) -> (i32, i32) {
    %c0_i32 = arith.constant 0 : i32
    %c0_i32_0 = arith.constant 0 : i32
    return %arg0, %c0_i32 : i32, i32
  }
}

</mosaic_0001>

<bundles_post_ra>
// kernel: tpu_custom_call.1
= control target key start
LH: loop header
LB: loop body
LE: loop exit
PB: predicated region body
PF: predicated region fallthrough
CT: control target
= control target key end

     0   :  { %8 = vsyncpa [#allocation5], 0  ;;  %s834_s0 = inlined_call_operand.hbm [shape: f32[2,32,256], index: 0, kind: input, shape index: {}]   ;;  %s835_s1 = inlined_call_operand.vmem [shape: f32[32,4], index: 1, kind: input, shape index: {}]   ;;  %s836_s2 = inlined_call_operand.vmem [shape: f32[4,32], index: 2, kind: input, shape index: {}]   ;;  %s837_s3 = inlined_call_operand.hbm [shape: f32[2,32], index: 3, kind: output, shape index: {}]  }
   0x1   :  { %9 = vsyncpa [#allocation6], 0  ;;  %s742_s12 = smov [#allocation4]   ;;  %s694_s16 = scalar_lea.hbm %s834_s0, 2048 }
   0x2   :  { %s15_s13 = sshll.u32 %s742_s12, 4  ;;  %p695_p0 = scmp.ne.s32.totalorder %s834_s0, %s694_s16  ;;  %s16_s13 = int_to_ptr.vmem [resolvable:$true] %s15_s13 }
   0x3   :  { %p698_p1 = scmp.lt.u32.totalorder %s694_s16, %s834_s0 }
   0x5   :  { %p700_p2 = pnand %p698_p1, %p695_p0 }
   0x7   :  { %703 = shalt.err (!%p700_p2)
}
   0x8   :  { %s704_s21 = scalar_lea.vmem %s16_s13, 2048  ;;  %p709_p4 = scmp.lt.s32.totalorder %s16_s13, %s16_s13 }
   0x9   :  { %p705_p3 = scmp.ne.s32.totalorder %s16_s13, %s704_s21  ;;  %p710_p5 = scmp.lt.s32.totalorder %s704_s21, %s704_s21 }
   0xb   :  { %p711_p6 = por %p710_p5, %p709_p4 }
   0xd   :  { %p712_p7 = pnand %p711_p6, %p705_p3 }
   0xf   :  { %715 = shalt.err (!%p712_p7)
}
  0x10   :  { %s743_s22 = smov 256   ;;  %s744_s23 = smov 16  }
  0x11   :  { %21 = dma.hbm_to_vmem [thread:$0]  %s834_s0, 2048, %s16_s13, [#allocation5], %s743_s22, %s743_s22, %s744_s23  }
  0x12   :  { %738 = dma.done.wait [#allocation5], 2048  }
  0x13   :  { %739 = vsyncadd [#allocation5], 4294965248  ;;  %v57_v0 = vld [vmem:[#allocation4 + $0x40] sm:$0xff]  ;;  %v58_v1 = vld [vmem:[#allocation4 + $0x48] sm:$0xff]  ;;  %v745_v35 = vmov 0.0|0.0   ;;  %vm746_vm0 = vmmov 0   ;;  %v201_v40 = vlaneseq }
  0x14   :  { %v49_v2 = vld [vmem:[#allocation4] sm:$0xff]  ;;  %v69_v3 = vadd.f32 %v58_v1, %v57_v0  ;;  %v50_v4 = vld [vmem:[#allocation4 + $0x8] sm:$0xff]  ;;  %v59_v5 = vld [vmem:[#allocation4 + $0x50] sm:$0xff]  ;;  %v77_v27 = vmax.f32 %v57_v0, %v58_v1  ;;  %670 = vmatprep.subr.bf16.mxu0 %v745_v35  ;;  %676 = vmatprep.subr.bf16.mxu1 %v745_v35  ;;  %v747_v39 = vmov 0.0   ;;  %vm212_vm1 = vcmask 130112  }
  0x15   :  { %v60_v6 = vld [vmem:[#allocation4 + $0x58] sm:$0xff]  ;;  %v65_v7 = vadd.f32 %v50_v4, %v49_v2  ;;  %v51_v8 = vld [vmem:[#allocation4 + $0x10] sm:$0xff]  ;;  %v61_v12 = vld [vmem:[#allocation4 + $0x60] sm:$0xff]  ;;  %v73_v25 = vmax.f32 %v49_v2, %v50_v4  ;;  %646 = vmatprep.mubr.msk.f32.mxu0 %vm746_vm0, %v747_v39  ;;  %657 = vmatprep.mubr.msk.f32.mxu1 %vm746_vm0, %v747_v39  ;;  %v202_v42 = vand.u32 127, %v201_v40  ;;  %v204_v47 = vshrl.u32 %v201_v40, 7 }
  0x16   :  { %v52_v9 = vld [vmem:[#allocation4 + $0x18] sm:$0xff]  ;;  %148 = vadd.xlane.f32.xlu1 %v69_v3  ;;  %v70_v10 = vadd.f32 %v60_v6, %v59_v5  ;;  %v62_v13 = vld [vmem:[#allocation4 + $0x68] sm:$0xff]  ;;  %v53_v14 = vld [vmem:[#allocation4 + $0x20] sm:$0xff]  ;;  %v78_v26 = vmax.f32 %v59_v5, %v60_v6  ;;  %vm219_vm2 = vcmask 195712   ;;  %vm226_vm3 = vcmask 261312  }
  0x17   :  { %140 = vadd.xlane.f32.xlu0 %v65_v7  ;;  %v66_v11 = vadd.f32 %v52_v9, %v51_v8  ;;  %v54_v15 = vld [vmem:[#allocation4 + $0x28] sm:$0xff]  ;;  %v71_v16 = vadd.f32 %v62_v13, %v61_v12  ;;  %v63_v18 = vld [vmem:[#allocation4 + $0x70] sm:$0xff]  ;;  %v64_v19 = vld [vmem:[#allocation4 + $0x78] sm:$0xff]  ;;  %v74_v24 = vmax.f32 %v51_v8, %v52_v9  ;;  %v79_v28 = vmax.f32 %v61_v12, %v62_v13 }
  0x18   :  { %v67_v17 = vadd.f32 %v54_v15, %v53_v14  ;;  %v55_v20 = vld [vmem:[#allocation4 + $0x30] sm:$0xff]  ;;  %v56_v21 = vld [vmem:[#allocation4 + $0x38] sm:$0xff]  ;;  %v72_v22 = vadd.f32 %v64_v19, %v63_v18  ;;  %v75_v29 = vmax.f32 %v53_v14, %v54_v15  ;;  %v188_v30 = vld [vmem:[%s835_s1] sm:$0xff]  ;;  %v80_v32 = vmax.f32 %v63_v18, %v64_v19 }
  0x19   :  { %v68_v23 = vadd.f32 %v56_v21, %v55_v20  ;;  %v189_v31 = vld [vmem:[%s835_s1 + $0x8] sm:$0xff]  ;;  %v76_v34 = vmax.f32 %v55_v20, %v56_v21  ;;  %v190_v36 = vld [vmem:[%s835_s1 + $0x10] sm:$0xff]  ;;  %v191_v37 = vld [vmem:[%s835_s1 + $0x18] sm:$0xff]  ;;  %v207_v44 = vadd.s32 4294967288, %v202_v42  ;;  %v214_v46 = vadd.s32 4294967280, %v202_v42 }
  0x1a   :  { %150 = vadd.xlane.f32.xlu1 %v70_v10  ;;  %v671_v33 = vpack.c.bf16 %v189_v31, %v188_v30  ;;  %v674_v38 = vpack.c.bf16 %v191_v37, %v190_v36  ;;  %v221_v51 = vadd.s32 4294967272, %v202_v42  ;;  %v205_v55 = vsub.s32 %v202_v42, %v204_v47 }
  0x1b   :  { %142 = vadd.xlane.f32.xlu0 %v66_v11  ;;  %v210_v49 = vsub.s32 %v207_v44, %v204_v47  ;;  %v217_v53 = vsub.s32 %v214_v46, %v204_v47  ;;  %vm247_vm4 = vcmask 1041409   ;;  %vm249_vm5 = vcmask 261120  }
  0x1c   :  { %672 = vmatpush3.bf16.msra.mxu0 %v671_v33  ;;  %678 = vmatpush3.bf16.msra.mxu1 %v671_v33  ;;  %v224_v62 = vsub.s32 %v221_v51, %v204_v47  ;;  %vm447_vm6 = vcmask 1043456   ;;  %vm443_vm7 = vcmask 31744   ;;  %vm600_vm8 = vcmask 254976  }
  0x1d   :  { %673 = vmatprep.subr.bf16.mxu0 %v745_v35  ;;  %679 = vmatprep.subr.bf16.mxu1 %v745_v35 }
  0x1e   :  { %152 = vadd.xlane.f32.xlu1 %v71_v16 }
  0x1f   :  { %144 = vadd.xlane.f32.xlu0 %v67_v17 }
  0x20   :  { %675 = vmatpush3.bf16.msra.mxu0 %v674_v38  ;;  %681 = vmatpush3.bf16.msra.mxu1 %v674_v38 }
  0x21   :  { %665 = vmatprep.subr.mxu0 %v747_v39  ;;  %660 = vmatprep.subr.mxu1 %v747_v39 }
  0x22   :  { %154 = vadd.xlane.f32.xlu1 %v72_v22 }
  0x23   :  { %146 = vadd.xlane.f32.xlu0 %v68_v23 }
  0x26   :  { %174 = vmax.xlane.f32.xlu1 %v74_v24 }
  0x27   :  { %172 = vmax.xlane.f32.xlu0 %v73_v25 }
  0x2a   :  { %182 = vmax.xlane.f32.xlu1 %v78_v26 }
  0x2b   :  { %180 = vmax.xlane.f32.xlu0 %v77_v27 }
  0x2e   :  { %184 = vmax.xlane.f32.xlu1 %v79_v28 }
  0x2f   :  { %176 = vmax.xlane.f32.xlu0 %v75_v29 }
  0x32   :  { %186 = vmax.xlane.f32.xlu1 %v80_v32 }
  0x33   :  { %178 = vmax.xlane.f32.xlu0 %v76_v34 }
  0xa3   :  { %v149_v41 = vpop.xlane.xlu1 %148 }
  0xa4   :  { %v141_v43 = vpop.xlane.xlu0 %140  ;;  %v160_v56 = vmul.f32 0.00390625, %v149_v41  ;;  %v192_v41 = vld [vmem:[%s836_s2] sm:$0xf]  ;;  %s748_s2 = smov [#allocation7]  }
  0xa5   :  { %v156_v59 = vmul.f32 0.00390625, %v141_v43  ;;  %s608_s7 = sshll.u32 %s748_s2, 4  ;;  %s609_s7 = int_to_ptr.vmem [resolvable:$true] %s608_s7 }
  0xa6   :  { %v231_v2 = vrot.slane %v160_v56, %v205_v55  ;;  %s716_s8 = scalar_lea.vmem %s609_s7, 32  ;;  %p721_p9 = scmp.lt.s32.totalorder %s609_s7, %s609_s7 }
  0xa7   :  { %v151_v45 = vpop.xlane.xlu1 %150  ;;  %v206_v6 = vrot.slane %v156_v59, %v205_v55  ;;  %p717_p8 = scmp.ne.s32.totalorder %s609_s7, %s716_s8  ;;  %p722_p10 = scmp.lt.s32.totalorder %s716_s8, %s716_s8 }
  0xa8   :  { %v143_v48 = vpop.xlane.xlu0 %142  ;;  %v161_v50 = vmul.f32 0.00390625, %v151_v45 }
  0xa9   :  { %v157_v52 = vmul.f32 0.00390625, %v143_v48  ;;  %p723_p11 = por %p722_p10, %p721_p9 }
  0xaa   :  { %v235_v61 = vrot.slane %v161_v50, %v210_v49 }
  0xab   :  { %v153_v54 = vpop.xlane.xlu1 %152  ;;  %v211_v63 = vrot.slane %v157_v52, %v210_v49  ;;  %p724_p12 = pnand %p723_p11, %p717_p8 }
  0xac   :  { %v162_v57 = vmul.f32 0.00390625, %v153_v54  ;;  %v145_v58 = vpop.xlane.xlu0 %144  ;;  %v236_v8 = vsel %vm212_vm1, %v235_v61, %v231_v2 }
  0xad   :  { %v158_v60 = vmul.f32 0.00390625, %v145_v58  ;;  %v213_v10 = vsel %vm212_vm1, %v211_v63, %v206_v6 }
  0xae   :  { %v240_v0 = vrot.slane %v162_v57, %v217_v53 }
  0xaf   :  { %v155_v1 = vpop.xlane.xlu1 %154  ;;  %v218_v3 = vrot.slane %v158_v60, %v217_v53 }
  0xb0   :  { %v163_v4 = vmul.f32 0.00390625, %v155_v1  ;;  %v147_v5 = vpop.xlane.xlu0 %146  ;;  %v241_v11 = vsel %vm219_vm2, %v240_v0, %v236_v8 }
  0xb1   :  { %v159_v7 = vmul.f32 0.00390625, %v147_v5  ;;  %v220_v14 = vsel %vm219_vm2, %v218_v3, %v213_v10 }
  0xb2   :  { %v245_v9 = vrot.slane %v163_v4, %v224_v62 }
  0xb3   :  { %v225_v12 = vrot.slane %v159_v7, %v224_v62  ;;  %v175_v13 = vpop.xlane.xlu1 %174 }
  0xb4   :  { %v173_v15 = vpop.xlane.xlu0 %172  ;;  %v246_v16 = vsel %vm226_vm3, %v245_v9, %v241_v11  ;;  %v338_v25 = vrot.slane %v175_v13, %v210_v49 }
  0xb5   :  { %v227_v17 = vsel %vm226_vm3, %v225_v12, %v220_v14  ;;  %v334_v26 = vrot.slane %v173_v15, %v205_v55 }
  0xb6   :  { %v248_v18 = vsel %vm247_vm4, %v246_v16, %v227_v17 }
  0xb7   :  { %647 = vmatmul.mubr.msk.f32.vlgmr.msra.gmra.mrb[0].mxu0 %vm249_vm5, %v248_v18  ;;  %v183_v19 = vpop.xlane.xlu1 %182  ;;  %v339_v33 = vsel %vm212_vm1, %v338_v25, %v334_v26 }
  0xb8   :  { %v181_v20 = vpop.xlane.xlu0 %180  ;;  %667 = vmatprep.mubr.msk.f32.mxu0 %vm746_vm0, %v747_v39  ;;  %v357_v22 = vrot.slane %v183_v19, %v210_v49  ;;  %666 = vmatpush3.msk.msra.mxu0 %vm447_vm6, %v192_v41 }
  0xb9   :  { %v353_v23 = vrot.slane %v181_v20, %v205_v55 }
  0xbb   :  { %v185_v21 = vpop.xlane.xlu1 %184  ;;  %v358_v30 = vsel %vm212_vm1, %v357_v22, %v353_v23 }
  0xbc   :  { %v177_v24 = vpop.xlane.xlu0 %176  ;;  %v362_v27 = vrot.slane %v185_v21, %v217_v53 }
  0xbd   :  { %v343_v28 = vrot.slane %v177_v24, %v217_v53 }
  0xbe   :  { %v363_v34 = vsel %vm219_vm2, %v362_v27, %v358_v30 }
  0xbf   :  { %v187_v29 = vpop.xlane.xlu1 %186  ;;  %v344_v36 = vsel %vm219_vm2, %v343_v28, %v339_v33 }
  0xc0   :  { %v367_v31 = vrot.slane %v187_v29, %v224_v62  ;;  %v179_v32 = vpop.xlane.xlu0 %178 }
  0xc1   :  { %v348_v35 = vrot.slane %v179_v32, %v224_v62 }
  0xc2   :  { %v368_v37 = vsel %vm226_vm3, %v367_v31, %v363_v34 }
  0xc3   :  { %v349_v38 = vsel %vm226_vm3, %v348_v35, %v344_v36 }
  0xc4   :  { %v369_v40 = vsel %vm247_vm4, %v368_v37, %v349_v38 }
  0xc5   :  { %658 = vmatmul.mubr.msk.f32.vlgmr.msra.gmra.mrb[0].mxu1 %vm249_vm5, %v369_v40 }
  0xc6   :  { %662 = vmatprep.mubr.msk.f32.mxu1 %vm746_vm0, %v747_v39  ;;  %661 = vmatpush3.msk.msra.mxu1 %vm447_vm6, %v192_v41 }
 0x18a   :  { %v318_v42 = vpop.f32.mrb[0].mxu0 }
 0x18b   :  { %v322_v43 = vmax.f32 %v318_v42, 0.0  ;;  %v648_v44 = vpop.f32.mrb[1].mxu0 }
 0x18d   :  { %668 = vmatmul.mubr.msk.f32.vlgmr.msra.gmra.mrb[2].mxu0 %vm443_vm7, %v322_v43 }
 0x198   :  { %v438_v45 = vpop.f32.mrb[0].mxu1 }
 0x199   :  { %v442_v46 = vmax.f32 %v438_v45, 0.0  ;;  %v659_v47 = vpop.f32.mrb[1].mxu1 }
 0x19b   :  { %663 = vmatmul.mubr.msk.f32.vlgmr.msra.gmra.mrb[2].mxu1 %vm443_vm7, %v442_v46 }
 0x260   :  { %v590_v48 = vpop.f32.mrb[2].mxu0 }
 0x261   :  { %v669_v49 = vpop.f32.mrb[3].mxu0 }
 0x26e   :  { %v517_v50 = vpop.f32.mrb[2].mxu1 }
 0x26f   :  { %v591_v39 = vadd.f32 %v590_v48, %v517_v50  ;;  %v664_v51 = vpop.f32.mrb[3].mxu1 }
 0x271   :  { %v623_v52 = vmul.f32 -1.442695, %v591_v39 }
 0x273   :  { %690 = vpow2.f32 %v623_v52 }
 0x27d   :  { %v691_v53 = vpop.eup %690 }
 0x27e   :  { %v597_v54 = vadd.f32 1.0, %v691_v53 }
 0x280   :  { %692 = vrcp.f32 %v597_v54 }
 0x28a   :  { %v693_v55 = vpop.eup %692 }
 0x28b   :  { %601 = vst.msk [vmem:[#allocation7] sm:$0x3] %vm600_vm8, %v693_v55 }
 0x28c   :  { %727 = shalt.err (!%p724_p12)
}
 0x28d   :  { %s728_s11 = scalar_lea.hbm %s837_s3, 32 }
 0x28e   :  { %p729_p13 = scmp.ne.s32.totalorder %s837_s3, %s728_s11  ;;  %p732_p0 = scmp.lt.u32.totalorder %s728_s11, %s837_s3 }
 0x290   :  { %p734_p1 = pnand %p732_p0, %p729_p13 }
 0x292   :  { %737 = shalt.err (!%p734_p1)
}
 0x293   :  { %611 = dma.vmem_to_hbm [thread:$0]  %s609_s7, 32, %s837_s3, [#allocation6]  }
 0x294   :  { %740 = dma.done.wait [#allocation6], 32  }
 0x295   :  { %741 = vsyncadd [#allocation6], 4294967264 }
 0x296   :  { %615 = vsyncpa [#allocation5], 1 }
 0x297   :  { %616 = vsyncpa [#allocation6], 1 }

</bundles_post_ra>
